<compile_context>
chip_gen: v5e
topology: v5e:2x2
jax: 0.10.0
libtpu: 0.0.40
codegen_flags: <defaults>
</compile_context>

<pallas_src>
import math
import numpy as np
import jax
import jax.numpy as jnp
from jax import lax
from jax.experimental import pallas as pl
from jax.experimental.pallas import tpu as pltpu

D_MODEL = 32
NHEAD = 4
HEAD_DIM = D_MODEL // NHEAD
DIM_FF = 64
LN_EPS = 1e-5

# Row layout of the packed vector table (width DIM_FF, zero padded):
#  0:bq(scaled) 1:bk 2:bv 3:bo 4:g1 5:be1 6:b1(64) 7:b2 8:g2 9:be2
_VEC_KEYS = ('bq', 'bk', 'bv', 'bo', 'g1', 'be1', 'b1', 'b2', 'g2', 'be2')


def _make_kernel(need_weights: bool, nb: int, L: int):
    M = nb * L
    f32 = jnp.float32

    def kernel(sp_ref, wq_ref, wk_ref, wv_ref, wo_ref, w1_ref, w2_ref, vec_ref,
               *out_refs):
        out_ref = out_refs[0]

        def vrow(i, n):
            return vec_ref[i:i + 1, 0:n]          # static (1, n) slice, f32

        # ---- activations: free (major-dim) reshapes only --------------------
        sp = sp_ref[...]                          # (nb, 2, L, E), matmul dtype
        x_src = sp[:, 0].reshape(M, D_MODEL)      # (M, E)
        x_qk = x_src + sp[:, 1].reshape(M, D_MODEL)   # fused src + pos

        # ---- full-width Q/K/V projections (K = E = 32, f32 accumulation) ----
        q = jnp.dot(x_qk, wq_ref[...], preferred_element_type=f32) + vrow(0, D_MODEL)
        k = jnp.dot(x_qk, wk_ref[...], preferred_element_type=f32) + vrow(1, D_MODEL)
        v = jnp.dot(x_src, wv_ref[...], preferred_element_type=f32) + vrow(2, D_MODEL)

        # ---- fold heads into the batch dim: (M, E) -> (H*nb, L, Dh) ----------
        # static lane slices + free major split + major-axis concat
        def to_heads(x):
            return jnp.concatenate(
                [x[:, h * HEAD_DIM:(h + 1) * HEAD_DIM].reshape(nb, L, HEAD_DIM)
                 for h in range(NHEAD)], axis=0)

        qh = to_heads(q)
        kh = to_heads(k)
        vh = to_heads(v)

        # ---- one batched score matmul + softmax + one batched ctx matmul ----
        s = jnp.einsum('bld,bsd->bls', qh, kh,
                       preferred_element_type=f32)              # (H*nb, L, L)
        s = s - jnp.max(s, axis=-1, keepdims=True)
        e = jnp.exp(s)
        denom = jnp.sum(e, axis=-1, keepdims=True)
        r = pl.reciprocal(denom, approx=True)                   # EUP rcp
        r = r * (2.0 - denom * r)                               # Newton -> ~f32 exact
        p = e * r

        if need_weights:
            p4 = p.reshape(NHEAD, nb, L, L)                     # free major split
            attn_avg = (p4[0] + p4[1] + p4[2] + p4[3]) * (1.0 / NHEAD)
            out_refs[1][...] = attn_avg                         # (nb, L, L)

        ctx = jnp.einsum('bls,bsd->bld', p, vh,
                         preferred_element_type=f32)            # (H*nb, L, Dh)
        # reassemble heads onto lanes: (M, E)
        ctx_flat = jnp.concatenate(
            [ctx[h * nb:(h + 1) * nb].reshape(M, HEAD_DIM) for h in range(NHEAD)],
            axis=-1)

        # ---- single output projection over all heads -------------------------
        attn_out = jnp.dot(ctx_flat.astype(wo_ref.dtype), wo_ref[...],
                           preferred_element_type=f32) + vrow(3, D_MODEL)

        # ---- residual + LayerNorm1 (f32, rsqrt on EUP) -----------------------
        r1 = x_src.astype(f32) + attn_out
        mu1 = jnp.mean(r1, axis=-1, keepdims=True)
        d1 = r1 - mu1
        var1 = jnp.mean(d1 * d1, axis=-1, keepdims=True)
        n1 = d1 * lax.rsqrt(var1 + LN_EPS) * vrow(4, D_MODEL) + vrow(5, D_MODEL)

        # ---- FFN: linear1 -> relu -> linear2 ---------------------------------
        h1 = jnp.dot(n1.astype(w1_ref.dtype), w1_ref[...],
                     preferred_element_type=f32) + vrow(6, DIM_FF)
        h1 = jnp.maximum(h1, 0.0)
        h2 = jnp.dot(h1.astype(w2_ref.dtype), w2_ref[...],
                     preferred_element_type=f32) + vrow(7, D_MODEL)

        # ---- residual + LayerNorm2 -------------------------------------------
        r2 = n1 + h2
        mu2 = jnp.mean(r2, axis=-1, keepdims=True)
        d2 = r2 - mu2
        var2 = jnp.mean(d2 * d2, axis=-1, keepdims=True)
        y = d2 * lax.rsqrt(var2 + LN_EPS) * vrow(8, D_MODEL) + vrow(9, D_MODEL)

        out_ref[...] = y.reshape(nb, L, D_MODEL)                # free major split

    return kernel


def transformer_encoder_layer(src_lne, pos_lne, params, *, need_weights=True,
                              block_batch=None, matmul_dtype=jnp.float32):
    """src_lne, pos_lne: (L, N, E) float32 (PyTorch seq-major layout).

    Returns (out (L, N, E) f32, attn (N, L, L) f32 or None).
    matmul_dtype: dtype used for activation/weight DMA and matmul operands
    (f32 default; bf16 recommended on v6e/v7x). All LN/softmax math stays f32.
    """
    L, N, E = src_lne.shape
    assert E == D_MODEL
    f32 = jnp.float32
    mdt = matmul_dtype

    # (L,N,E) -> (N,L,E); combine src+pos into ONE input (single DMA stream/step).
    src = jnp.transpose(src_lne, (1, 0, 2))
    pos = jnp.transpose(pos_lne, (1, 0, 2))
    sp = jnp.stack([src, pos], axis=1).astype(mdt)              # (N, 2, L, E)

    # Batch block: target ~512 matmul rows per step; keep >=2 grid steps when N
    # allows (v7x two-TC split via "parallel"); nb must divide N.
    if block_batch is None:
        nb = max(1, min(N, 512 // max(L, 1)))
        if N >= 2:
            nb = min(nb, max(1, N // 2))
        while N % nb:
            nb -= 1
    else:
        nb = block_batch
        assert N % nb == 0
    grid = (N // nb,)

    scale = 1.0 / math.sqrt(HEAD_DIM)
    wq = (params['wq'].T * scale).astype(mdt)    # 1/sqrt(Dh) folded into Wq
    wk = params['wk'].T.astype(mdt)
    wv = params['wv'].T.astype(mdt)
    wo = params['wo'].T.astype(mdt)
    w1 = params['w1'].T.astype(mdt)              # (E, F)
    w2 = params['w2'].T.astype(mdt)              # (F, E)

    # Pack all 1-D vectors into one (10, DIM_FF) f32 table -> one DMA.
    def pad_row(v):
        v = v.astype(f32).reshape(1, -1)
        return jnp.pad(v, ((0, 0), (0, DIM_FF - v.shape[1])))

    vec_vals = {**params, 'bq': params['bq'] * scale}           # scale folded into bq
    vecs = jnp.concatenate([pad_row(vec_vals[k]) for k in _VEC_KEYS], axis=0)

    kernel = _make_kernel(need_weights, nb, L)

    def const_spec(shape):
        n = len(shape)
        return pl.BlockSpec(shape, lambda b, n=n: (0,) * n)

    in_specs = [
        pl.BlockSpec((nb, 2, L, E), lambda b: (b, 0, 0, 0)),    # combined src/pos
        const_spec(wq.shape), const_spec(wk.shape), const_spec(wv.shape),
        const_spec(wo.shape), const_spec(w1.shape), const_spec(w2.shape),
        const_spec(vecs.shape),
    ]

    out_shapes = [jax.ShapeDtypeStruct((N, L, E), f32)]
    out_specs = [pl.BlockSpec((nb, L, E), lambda b: (b, 0, 0))]
    if need_weights:
        out_shapes.append(jax.ShapeDtypeStruct((N, L, L), f32))
        out_specs.append(pl.BlockSpec((nb, L, L), lambda b: (b, 0, 0)))

    outs = pl.pallas_call(
        kernel,
        out_shape=tuple(out_shapes),
        grid_spec=pltpu.PrefetchScalarGridSpec(
            num_scalar_prefetch=0,
            grid=grid,
            in_specs=in_specs,
            out_specs=tuple(out_specs),
        ),
        compiler_params=pltpu.CompilerParams(dimension_semantics=("parallel",)),
    )(sp, wq, wk, wv, wo, w1, w2, vecs)

    out = jnp.transpose(outs[0], (1, 0, 2))                     # back to (L, N, E)
    attn = outs[1] if need_weights else None
    return out, attn


def reference(src_lne, pos_lne, p):
    """Pure-JAX replica of the PyTorch forward (eval mode)."""
    L, N, E = src_lne.shape
    qk = src_lne + pos_lne

    def lin(x, w, b):
        return x @ w.T + b

    q = lin(qk, p['wq'], p['bq'])
    k = lin(qk, p['wk'], p['bk'])
    v = lin(src_lne, p['wv'], p['bv'])

    def split_heads(x):                                         # (L,N,E)->(N,H,L,Dh)
        return jnp.transpose(x.reshape(L, N, NHEAD, HEAD_DIM), (1, 2, 0, 3))

    qh = split_heads(q) / math.sqrt(HEAD_DIM)
    kh = split_heads(k)
    vh = split_heads(v)
    scores = jnp.einsum('nhld,nhsd->nhls', qh, kh)
    pattn = jax.nn.softmax(scores, axis=-1)
    attn_avg = jnp.mean(pattn, axis=1)                          # (N, L, L)
    ctx = jnp.einsum('nhls,nhsd->nhld', pattn, vh)
    ctx = jnp.transpose(ctx, (2, 0, 1, 3)).reshape(L, N, E)
    src2 = lin(ctx, p['wo'], p['bo'])

    def layernorm(x, g, b):
        mu = jnp.mean(x, axis=-1, keepdims=True)
        var = jnp.mean((x - mu) ** 2, axis=-1, keepdims=True)
        return (x - mu) / jnp.sqrt(var + LN_EPS) * g + b

    x1 = layernorm(src_lne + src2, p['g1'], p['be1'])
    ff = lin(jnp.maximum(lin(x1, p['w1'], p['b1']), 0.0), p['w2'], p['b2'])
    x2 = layernorm(x1 + ff, p['g2'], p['be2'])
    return x2, attn_avg


def init_params(key):
    ks = jax.random.split(key, 10)
    s = 0.1
    return {
        'wq': s * jax.random.normal(ks[0], (D_MODEL, D_MODEL), jnp.float32),
        'bq': s * jax.random.normal(ks[1], (D_MODEL,), jnp.float32),
        'wk': s * jax.random.normal(ks[2], (D_MODEL, D_MODEL), jnp.float32),
        'bk': s * jax.random.normal(ks[3], (D_MODEL,), jnp.float32),
        'wv': s * jax.random.normal(ks[4], (D_MODEL, D_MODEL), jnp.float32),
        'bv': s * jax.random.normal(ks[5], (D_MODEL,), jnp.float32),
        'wo': s * jax.random.normal(ks[6], (D_MODEL, D_MODEL), jnp.float32),
        'bo': jnp.zeros((D_MODEL,), jnp.float32),
        'g1': jnp.ones((D_MODEL,), jnp.float32),
        'be1': jnp.zeros((D_MODEL,), jnp.float32),
        'w1': s * jax.random.normal(ks[7], (DIM_FF, D_MODEL), jnp.float32),
        'b1': s * jax.random.normal(ks[8], (DIM_FF,), jnp.float32),
        'w2': s * jax.random.normal(ks[9], (D_MODEL, DIM_FF), jnp.float32),
        'b2': jnp.zeros((D_MODEL,), jnp.float32),
        'g2': jnp.ones((D_MODEL,), jnp.float32),
        'be2': jnp.zeros((D_MODEL,), jnp.float32),
    }


if __name__ == "__main__":
    key = jax.random.PRNGKey(0)
    k_src, k_pos, k_par = jax.random.split(key, 3)
    params = init_params(k_par)

    # f32 path (exact-ish): small-batch and multi-block-batch configurations.
    for (L, N) in [(8, 2), (8, 8)]:
        src = jax.random.normal(k_src, (L, N, D_MODEL), jnp.float32)
        pos = jax.random.normal(k_pos, (L, N, D_MODEL), jnp.float32)
        ref_out, ref_attn = reference(src, pos, params)

        out, attn = transformer_encoder_layer(src, pos, params, need_weights=True)
        out = jax.block_until_ready(out)
        attn = jax.block_until_ready(attn)
        np.testing.assert_allclose(np.asarray(out), np.asarray(ref_out),
                                   rtol=1e-4, atol=1e-4)
        np.testing.assert_allclose(np.asarray(attn), np.asarray(ref_attn),
                                   rtol=1e-4, atol=1e-5)

        # Weights-free fast path (skips the (N, L, L) output entirely).
        out_nw, attn_nw = transformer_encoder_layer(src, pos, params,
                                                    need_weights=False)
        out_nw = jax.block_until_ready(out_nw)
        assert attn_nw is None
        np.testing.assert_allclose(np.asarray(out_nw), np.asarray(ref_out),
                                   rtol=1e-4, atol=1e-4)

    # bf16 DMA/matmul-operand path (v6e/v7x oriented) — looser tolerance.
    L, N = 8, 8
    src = jax.random.normal(k_src, (L, N, D_MODEL), jnp.float32)
    pos = jax.random.normal(k_pos, (L, N, D_MODEL), jnp.float32)
    ref_out, ref_attn = reference(src, pos, params)
    out_bf, attn_bf = transformer_encoder_layer(src, pos, params, need_weights=True,
                                                matmul_dtype=jnp.bfloat16)
    out_bf = jax.block_until_ready(out_bf)
    attn_bf = jax.block_until_ready(attn_bf)
    np.testing.assert_allclose(np.asarray(out_bf), np.asarray(ref_out),
                               rtol=5e-2, atol=5e-2)
    np.testing.assert_allclose(np.asarray(attn_bf), np.asarray(ref_attn),
                               rtol=5e-2, atol=2e-2)

    print("KERNEL_OK")
</pallas_src>

<mosaic_0001>
module attributes {stable_mosaic.version = 11 : i64} {
  func.func @kernel(%arg0: i32, %arg1: memref<1x2x8x32xf32, #tpu.memory_space<vmem>>, %arg2: memref<32x32xf32, #tpu.memory_space<vmem>>, %arg3: memref<32x32xf32, #tpu.memory_space<vmem>>, %arg4: memref<32x32xf32, #tpu.memory_space<vmem>>, %arg5: memref<32x32xf32, #tpu.memory_space<vmem>>, %arg6: memref<32x64xf32, #tpu.memory_space<vmem>>, %arg7: memref<64x32xf32, #tpu.memory_space<vmem>>, %arg8: memref<10x64xf32, #tpu.memory_space<vmem>>, %arg9: memref<1x8x32xf32, #tpu.memory_space<vmem>>, %arg10: memref<1x8x8xf32, #tpu.memory_space<vmem>>) attributes {dimension_semantics = [#tpu.dimension_semantics<parallel>], iteration_bounds = array<i64: 2>, scalar_prefetch = 0 : i64, scratch_operands = 0 : i64, tpu.core_type = #tpu.core_type<tc>, window_params = [{transform_indices = @transform_0, window_bounds = array<i64: 1, 2, 8, 32>}, {pipeline_mode = #tpu.pipeline_mode<synchronous>, transform_indices = @transform_1, window_bounds = array<i64: 32, 32>}, {pipeline_mode = #tpu.pipeline_mode<synchronous>, transform_indices = @transform_2, window_bounds = array<i64: 32, 32>}, {pipeline_mode = #tpu.pipeline_mode<synchronous>, transform_indices = @transform_3, window_bounds = array<i64: 32, 32>}, {pipeline_mode = #tpu.pipeline_mode<synchronous>, transform_indices = @transform_4, window_bounds = array<i64: 32, 32>}, {pipeline_mode = #tpu.pipeline_mode<synchronous>, transform_indices = @transform_5, window_bounds = array<i64: 32, 64>}, {pipeline_mode = #tpu.pipeline_mode<synchronous>, transform_indices = @transform_6, window_bounds = array<i64: 64, 32>}, {pipeline_mode = #tpu.pipeline_mode<synchronous>, transform_indices = @transform_7, window_bounds = array<i64: 10, 64>}, {transform_indices = @transform_8, window_bounds = array<i64: 1, 8, 32>}, {transform_indices = @transform_9, window_bounds = array<i64: 1, 8, 8>}]} {
    %c0 = arith.constant 0 : index
    %c0_0 = arith.constant 0 : index
    %c0_1 = arith.constant 0 : index
    %c0_2 = arith.constant 0 : index
    %0 = vector.load %arg1[%c0, %c0_0, %c0_1, %c0_2] : memref<1x2x8x32xf32, #tpu.memory_space<vmem>>, vector<1x2x8x32xf32>
    %1 = vector.extract_strided_slice %0 {offsets = [0, 0, 0, 0], sizes = [1, 1, 8, 32], strides = [1, 1, 1, 1]} : vector<1x2x8x32xf32> to vector<1x1x8x32xf32>
    %2 = vector.shape_cast %1 : vector<1x1x8x32xf32> to vector<1x8x32xf32>
    %3 = vector.shape_cast %2 : vector<1x8x32xf32> to vector<8x32xf32>
    %4 = vector.extract_strided_slice %0 {offsets = [0, 1, 0, 0], sizes = [1, 1, 8, 32], strides = [1, 1, 1, 1]} : vector<1x2x8x32xf32> to vector<1x1x8x32xf32>
    %5 = vector.shape_cast %4 : vector<1x1x8x32xf32> to vector<1x8x32xf32>
    %6 = vector.shape_cast %5 : vector<1x8x32xf32> to vector<8x32xf32>
    %7 = arith.addf %3, %6 : vector<8x32xf32>
    %c0_3 = arith.constant 0 : index
    %c0_4 = arith.constant 0 : index
    %8 = vector.load %arg2[%c0_3, %c0_4] : memref<32x32xf32, #tpu.memory_space<vmem>>, vector<32x32xf32>
    %cst = arith.constant dense<0.000000e+00> : vector<8x32xf32>
    %9 = tpu.matmul %7, %8, %cst {dimension_numbers = #tpu.dot_dimension_numbers<[1], [0], [0], [1], [0, 0, 1, 1], [], []>} : vector<8x32xf32>, vector<32x32xf32>, vector<8x32xf32> -> vector<8x32xf32>
    %c0_5 = arith.constant 0 : index
    %c0_6 = arith.constant 0 : index
    %10 = vector.load %arg8[%c0_5, %c0_6] : memref<10x64xf32, #tpu.memory_space<vmem>>, vector<1x32xf32>
    %11 = vector.broadcast %10 : vector<1x32xf32> to vector<8x32xf32>
    %12 = arith.addf %9, %11 : vector<8x32xf32>
    %c0_7 = arith.constant 0 : index
    %c0_8 = arith.constant 0 : index
    %13 = vector.load %arg3[%c0_7, %c0_8] : memref<32x32xf32, #tpu.memory_space<vmem>>, vector<32x32xf32>
    %cst_9 = arith.constant dense<0.000000e+00> : vector<8x32xf32>
    %14 = tpu.matmul %7, %13, %cst_9 {dimension_numbers = #tpu.dot_dimension_numbers<[1], [0], [0], [1], [0, 0, 1, 1], [], []>} : vector<8x32xf32>, vector<32x32xf32>, vector<8x32xf32> -> vector<8x32xf32>
    %c1 = arith.constant 1 : index
    %c0_10 = arith.constant 0 : index
    %15 = vector.load %arg8[%c1, %c0_10] : memref<10x64xf32, #tpu.memory_space<vmem>>, vector<1x32xf32>
    %16 = vector.broadcast %15 : vector<1x32xf32> to vector<8x32xf32>
    %17 = arith.addf %14, %16 : vector<8x32xf32>
    %c0_11 = arith.constant 0 : index
    %c0_12 = arith.constant 0 : index
    %18 = vector.load %arg4[%c0_11, %c0_12] : memref<32x32xf32, #tpu.memory_space<vmem>>, vector<32x32xf32>
    %cst_13 = arith.constant dense<0.000000e+00> : vector<8x32xf32>
    %19 = tpu.matmul %3, %18, %cst_13 {dimension_numbers = #tpu.dot_dimension_numbers<[1], [0], [0], [1], [0, 0, 1, 1], [], []>} : vector<8x32xf32>, vector<32x32xf32>, vector<8x32xf32> -> vector<8x32xf32>
    %c2 = arith.constant 2 : index
    %c0_14 = arith.constant 0 : index
    %20 = vector.load %arg8[%c2, %c0_14] : memref<10x64xf32, #tpu.memory_space<vmem>>, vector<1x32xf32>
    %21 = vector.broadcast %20 : vector<1x32xf32> to vector<8x32xf32>
    %22 = arith.addf %19, %21 : vector<8x32xf32>
    %23 = vector.extract_strided_slice %12 {offsets = [0, 0], sizes = [8, 8], strides = [1, 1]} : vector<8x32xf32> to vector<8x8xf32>
    %24 = vector.shape_cast %23 : vector<8x8xf32> to vector<1x8x8xf32>
    %25 = vector.extract_strided_slice %12 {offsets = [0, 8], sizes = [8, 8], strides = [1, 1]} : vector<8x32xf32> to vector<8x8xf32>
    %26 = vector.shape_cast %25 : vector<8x8xf32> to vector<1x8x8xf32>
    %27 = vector.extract_strided_slice %12 {offsets = [0, 16], sizes = [8, 8], strides = [1, 1]} : vector<8x32xf32> to vector<8x8xf32>
    %28 = vector.shape_cast %27 : vector<8x8xf32> to vector<1x8x8xf32>
    %29 = vector.extract_strided_slice %12 {offsets = [0, 24], sizes = [8, 8], strides = [1, 1]} : vector<8x32xf32> to vector<8x8xf32>
    %30 = vector.shape_cast %29 : vector<8x8xf32> to vector<1x8x8xf32>
    %31 = tpu.concatenate %24, %26, %28, %30 in 0 : vector<1x8x8xf32>, vector<1x8x8xf32>, vector<1x8x8xf32>, vector<1x8x8xf32> -> vector<4x8x8xf32>
    %32 = vector.extract_strided_slice %17 {offsets = [0, 0], sizes = [8, 8], strides = [1, 1]} : vector<8x32xf32> to vector<8x8xf32>
    %33 = vector.shape_cast %32 : vector<8x8xf32> to vector<1x8x8xf32>
    %34 = vector.extract_strided_slice %17 {offsets = [0, 8], sizes = [8, 8], strides = [1, 1]} : vector<8x32xf32> to vector<8x8xf32>
    %35 = vector.shape_cast %34 : vector<8x8xf32> to vector<1x8x8xf32>
    %36 = vector.extract_strided_slice %17 {offsets = [0, 16], sizes = [8, 8], strides = [1, 1]} : vector<8x32xf32> to vector<8x8xf32>
    %37 = vector.shape_cast %36 : vector<8x8xf32> to vector<1x8x8xf32>
    %38 = vector.extract_strided_slice %17 {offsets = [0, 24], sizes = [8, 8], strides = [1, 1]} : vector<8x32xf32> to vector<8x8xf32>
    %39 = vector.shape_cast %38 : vector<8x8xf32> to vector<1x8x8xf32>
    %40 = tpu.concatenate %33, %35, %37, %39 in 0 : vector<1x8x8xf32>, vector<1x8x8xf32>, vector<1x8x8xf32>, vector<1x8x8xf32> -> vector<4x8x8xf32>
    %41 = vector.extract_strided_slice %22 {offsets = [0, 0], sizes = [8, 8], strides = [1, 1]} : vector<8x32xf32> to vector<8x8xf32>
    %42 = vector.shape_cast %41 : vector<8x8xf32> to vector<1x8x8xf32>
    %43 = vector.extract_strided_slice %22 {offsets = [0, 8], sizes = [8, 8], strides = [1, 1]} : vector<8x32xf32> to vector<8x8xf32>
    %44 = vector.shape_cast %43 : vector<8x8xf32> to vector<1x8x8xf32>
    %45 = vector.extract_strided_slice %22 {offsets = [0, 16], sizes = [8, 8], strides = [1, 1]} : vector<8x32xf32> to vector<8x8xf32>
    %46 = vector.shape_cast %45 : vector<8x8xf32> to vector<1x8x8xf32>
    %47 = vector.extract_strided_slice %22 {offsets = [0, 24], sizes = [8, 8], strides = [1, 1]} : vector<8x32xf32> to vector<8x8xf32>
    %48 = vector.shape_cast %47 : vector<8x8xf32> to vector<1x8x8xf32>
    %49 = tpu.concatenate %42, %44, %46, %48 in 0 : vector<1x8x8xf32>, vector<1x8x8xf32>, vector<1x8x8xf32>, vector<1x8x8xf32> -> vector<4x8x8xf32>
    "tpu.trace_start"() <{level = 10 : i32, message = "bld,bsd->bls"}> : () -> ()
    %cst_15 = arith.constant dense<0.000000e+00> : vector<4x8x8xf32>
    %50 = tpu.matmul %31, %40, %cst_15 {dimension_numbers = #tpu.dot_dimension_numbers<[2], [2], [1], [1], [0, 0, 0, 1, 1, 1], [0], [0]>} : vector<4x8x8xf32>, vector<4x8x8xf32>, vector<4x8x8xf32> -> vector<4x8x8xf32>
    "tpu.trace_stop"() : () -> ()
    %cst_16 = arith.constant dense<0xFF800000> : vector<4x8xf32>
    %51 = vector.multi_reduction <maximumf>, %50, %cst_16 [2] : vector<4x8x8xf32> to vector<4x8xf32>
    %52 = vector.shape_cast %51 : vector<4x8xf32> to vector<4x8x1xf32>
    %53 = vector.broadcast %52 : vector<4x8x1xf32> to vector<4x8x8xf32>
    %54 = arith.subf %50, %53 : vector<4x8x8xf32>
    %55 = math.exp %54 : vector<4x8x8xf32>
    %cst_17 = arith.constant dense<0.000000e+00> : vector<4x8xf32>
    %56 = vector.multi_reduction <add>, %55, %cst_17 [2] : vector<4x8x8xf32> to vector<4x8xf32>
    %57 = vector.shape_cast %56 : vector<4x8xf32> to vector<4x8x1xf32>
    %58 = tpu.reciprocal %57 {approx = true} : vector<4x8x1xf32> -> vector<4x8x1xf32>
    %59 = arith.mulf %57, %58 : vector<4x8x1xf32>
    %cst_18 = arith.constant 2.000000e+00 : f32
    %60 = vector.broadcast %cst_18 : f32 to vector<4x8x1xf32>
    %61 = arith.subf %60, %59 : vector<4x8x1xf32>
    %62 = arith.mulf %58, %61 : vector<4x8x1xf32>
    %63 = vector.broadcast %62 : vector<4x8x1xf32> to vector<4x8x8xf32>
    %64 = arith.mulf %55, %63 : vector<4x8x8xf32>
    %65 = vector.shape_cast %64 : vector<4x8x8xf32> to vector<4x1x8x8xf32>
    %66 = vector.extract_strided_slice %65 {offsets = [0, 0, 0, 0], sizes = [1, 1, 8, 8], strides = [1, 1, 1, 1]} : vector<4x1x8x8xf32> to vector<1x1x8x8xf32>
    %67 = vector.shape_cast %66 : vector<1x1x8x8xf32> to vector<1x8x8xf32>
    %68 = vector.extract_strided_slice %65 {offsets = [1, 0, 0, 0], sizes = [1, 1, 8, 8], strides = [1, 1, 1, 1]} : vector<4x1x8x8xf32> to vector<1x1x8x8xf32>
    %69 = vector.shape_cast %68 : vector<1x1x8x8xf32> to vector<1x8x8xf32>
    %70 = arith.addf %67, %69 : vector<1x8x8xf32>
    %71 = vector.extract_strided_slice %65 {offsets = [2, 0, 0, 0], sizes = [1, 1, 8, 8], strides = [1, 1, 1, 1]} : vector<4x1x8x8xf32> to vector<1x1x8x8xf32>
    %72 = vector.shape_cast %71 : vector<1x1x8x8xf32> to vector<1x8x8xf32>
    %73 = arith.addf %70, %72 : vector<1x8x8xf32>
    %74 = vector.extract_strided_slice %65 {offsets = [3, 0, 0, 0], sizes = [1, 1, 8, 8], strides = [1, 1, 1, 1]} : vector<4x1x8x8xf32> to vector<1x1x8x8xf32>
    %75 = vector.shape_cast %74 : vector<1x1x8x8xf32> to vector<1x8x8xf32>
    %76 = arith.addf %73, %75 : vector<1x8x8xf32>
    %cst_19 = arith.constant 2.500000e-01 : f32
    %77 = vector.broadcast %cst_19 : f32 to vector<1x8x8xf32>
    %78 = arith.mulf %76, %77 : vector<1x8x8xf32>
    %c0_20 = arith.constant 0 : index
    %c0_21 = arith.constant 0 : index
    %c0_22 = arith.constant 0 : index
    %79 = vector.load %arg10[%c0_20, %c0_21, %c0_22] : memref<1x8x8xf32, #tpu.memory_space<vmem>>, vector<1x8x8xf32>
    tpu.vector_store %arg10[%c0_20, %c0_21, %c0_22], %78 {strides = array<i32>} : memref<1x8x8xf32, #tpu.memory_space<vmem>>, vector<1x8x8xf32>,
    "tpu.trace_start"() <{level = 10 : i32, message = "bls,bsd->bld"}> : () -> ()
    %cst_23 = arith.constant dense<0.000000e+00> : vector<4x8x8xf32>
    %80 = tpu.matmul %64, %49, %cst_23 {dimension_numbers = #tpu.dot_dimension_numbers<[2], [1], [1], [2], [0, 0, 0, 1, 1, 2], [0], [0]>} : vector<4x8x8xf32>, vector<4x8x8xf32>, vector<4x8x8xf32> -> vector<4x8x8xf32>
    "tpu.trace_stop"() : () -> ()
    %81 = vector.extract_strided_slice %80 {offsets = [0, 0, 0], sizes = [1, 8, 8], strides = [1, 1, 1]} : vector<4x8x8xf32> to vector<1x8x8xf32>
    %82 = vector.shape_cast %81 : vector<1x8x8xf32> to vector<8x8xf32>
    %83 = vector.extract_strided_slice %80 {offsets = [1, 0, 0], sizes = [1, 8, 8], strides = [1, 1, 1]} : vector<4x8x8xf32> to vector<1x8x8xf32>
    %84 = vector.shape_cast %83 : vector<1x8x8xf32> to vector<8x8xf32>
    %85 = vector.extract_strided_slice %80 {offsets = [2, 0, 0], sizes = [1, 8, 8], strides = [1, 1, 1]} : vector<4x8x8xf32> to vector<1x8x8xf32>
    %86 = vector.shape_cast %85 : vector<1x8x8xf32> to vector<8x8xf32>
    %87 = vector.extract_strided_slice %80 {offsets = [3, 0, 0], sizes = [1, 8, 8], strides = [1, 1, 1]} : vector<4x8x8xf32> to vector<1x8x8xf32>
    %88 = vector.shape_cast %87 : vector<1x8x8xf32> to vector<8x8xf32>
    %89 = tpu.concatenate %82, %84, %86, %88 in 1 : vector<8x8xf32>, vector<8x8xf32>, vector<8x8xf32>, vector<8x8xf32> -> vector<8x32xf32>
    %c0_24 = arith.constant 0 : index
    %c0_25 = arith.constant 0 : index
    %90 = vector.load %arg5[%c0_24, %c0_25] : memref<32x32xf32, #tpu.memory_space<vmem>>, vector<32x32xf32>
    %cst_26 = arith.constant dense<0.000000e+00> : vector<8x32xf32>
    %91 = tpu.matmul %89, %90, %cst_26 {dimension_numbers = #tpu.dot_dimension_numbers<[1], [0], [0], [1], [0, 0, 1, 1], [], []>} : vector<8x32xf32>, vector<32x32xf32>, vector<8x32xf32> -> vector<8x32xf32>
    %c3 = arith.constant 3 : index
    %c0_27 = arith.constant 0 : index
    %92 = vector.load %arg8[%c3, %c0_27] : memref<10x64xf32, #tpu.memory_space<vmem>>, vector<1x32xf32>
    %93 = vector.broadcast %92 : vector<1x32xf32> to vector<8x32xf32>
    %94 = arith.addf %91, %93 : vector<8x32xf32>
    %95 = arith.addf %3, %94 : vector<8x32xf32>
    %cst_28 = arith.constant dense<0.000000e+00> : vector<8xf32>
    %96 = vector.multi_reduction <add>, %95, %cst_28 [1] : vector<8x32xf32> to vector<8xf32>
    %97 = vector.shape_cast %96 : vector<8xf32> to vector<8x1xf32>
    %cst_29 = arith.constant 3.200000e+01 : f32
    %98 = vector.broadcast %cst_29 : f32 to vector<8x1xf32>
    %99 = arith.divf %97, %98 : vector<8x1xf32>
    %100 = vector.broadcast %99 : vector<8x1xf32> to vector<8x32xf32>
    %101 = arith.subf %95, %100 : vector<8x32xf32>
    %102 = arith.mulf %101, %101 : vector<8x32xf32>
    %cst_30 = arith.constant dense<0.000000e+00> : vector<8xf32>
    %103 = vector.multi_reduction <add>, %102, %cst_30 [1] : vector<8x32xf32> to vector<8xf32>
    %104 = vector.shape_cast %103 : vector<8xf32> to vector<8x1xf32>
    %cst_31 = arith.constant 3.200000e+01 : f32
    %105 = vector.broadcast %cst_31 : f32 to vector<8x1xf32>
    %106 = arith.divf %104, %105 : vector<8x1xf32>
    %cst_32 = arith.constant 9.99999974E-6 : f32
    %107 = vector.broadcast %cst_32 : f32 to vector<8x1xf32>
    %108 = arith.addf %106, %107 : vector<8x1xf32>
    %109 = math.rsqrt %108 : vector<8x1xf32>
    %110 = vector.broadcast %109 : vector<8x1xf32> to vector<8x32xf32>
    %111 = arith.mulf %101, %110 : vector<8x32xf32>
    %c4 = arith.constant 4 : index
    %c0_33 = arith.constant 0 : index
    %112 = vector.load %arg8[%c4, %c0_33] : memref<10x64xf32, #tpu.memory_space<vmem>>, vector<1x32xf32>
    %113 = vector.broadcast %112 : vector<1x32xf32> to vector<8x32xf32>
    %114 = arith.mulf %111, %113 : vector<8x32xf32>
    %c5 = arith.constant 5 : index
    %c0_34 = arith.constant 0 : index
    %115 = vector.load %arg8[%c5, %c0_34] : memref<10x64xf32, #tpu.memory_space<vmem>>, vector<1x32xf32>
    %116 = vector.broadcast %115 : vector<1x32xf32> to vector<8x32xf32>
    %117 = arith.addf %114, %116 : vector<8x32xf32>
    %c0_35 = arith.constant 0 : index
    %c0_36 = arith.constant 0 : index
    %118 = vector.load %arg6[%c0_35, %c0_36] : memref<32x64xf32, #tpu.memory_space<vmem>>, vector<32x64xf32>
    %cst_37 = arith.constant dense<0.000000e+00> : vector<8x64xf32>
    %119 = tpu.matmul %117, %118, %cst_37 {dimension_numbers = #tpu.dot_dimension_numbers<[1], [0], [0], [1], [0, 0, 1, 1], [], []>} : vector<8x32xf32>, vector<32x64xf32>, vector<8x64xf32> -> vector<8x64xf32>
    %c6 = arith.constant 6 : index
    %c0_38 = arith.constant 0 : index
    %120 = vector.load %arg8[%c6, %c0_38] : memref<10x64xf32, #tpu.memory_space<vmem>>, vector<1x64xf32>
    %121 = vector.broadcast %120 : vector<1x64xf32> to vector<8x64xf32>
    %122 = arith.addf %119, %121 : vector<8x64xf32>
    %cst_39 = arith.constant 0.000000e+00 : f32
    %123 = vector.broadcast %cst_39 : f32 to vector<8x64xf32>
    %124 = arith.maximumf %122, %123 : vector<8x64xf32>
    %c0_40 = arith.constant 0 : index
    %c0_41 = arith.constant 0 : index
    %125 = vector.load %arg7[%c0_40, %c0_41] : memref<64x32xf32, #tpu.memory_space<vmem>>, vector<64x32xf32>
    %cst_42 = arith.constant dense<0.000000e+00> : vector<8x32xf32>
    %126 = tpu.matmul %124, %125, %cst_42 {dimension_numbers = #tpu.dot_dimension_numbers<[1], [0], [0], [1], [0, 0, 1, 1], [], []>} : vector<8x64xf32>, vector<64x32xf32>, vector<8x32xf32> -> vector<8x32xf32>
    %c7 = arith.constant 7 : index
    %c0_43 = arith.constant 0 : index
    %127 = vector.load %arg8[%c7, %c0_43] : memref<10x64xf32, #tpu.memory_space<vmem>>, vector<1x32xf32>
    %128 = vector.broadcast %127 : vector<1x32xf32> to vector<8x32xf32>
    %129 = arith.addf %126, %128 : vector<8x32xf32>
    %130 = arith.addf %117, %129 : vector<8x32xf32>
    %cst_44 = arith.constant dense<0.000000e+00> : vector<8xf32>
    %131 = vector.multi_reduction <add>, %130, %cst_44 [1] : vector<8x32xf32> to vector<8xf32>
    %132 = vector.shape_cast %131 : vector<8xf32> to vector<8x1xf32>
    %cst_45 = arith.constant 3.200000e+01 : f32
    %133 = vector.broadcast %cst_45 : f32 to vector<8x1xf32>
    %134 = arith.divf %132, %133 : vector<8x1xf32>
    %135 = vector.broadcast %134 : vector<8x1xf32> to vector<8x32xf32>
    %136 = arith.subf %130, %135 : vector<8x32xf32>
    %137 = arith.mulf %136, %136 : vector<8x32xf32>
    %cst_46 = arith.constant dense<0.000000e+00> : vector<8xf32>
    %138 = vector.multi_reduction <add>, %137, %cst_46 [1] : vector<8x32xf32> to vector<8xf32>
    %139 = vector.shape_cast %138 : vector<8xf32> to vector<8x1xf32>
    %cst_47 = arith.constant 3.200000e+01 : f32
    %140 = vector.broadcast %cst_47 : f32 to vector<8x1xf32>
    %141 = arith.divf %139, %140 : vector<8x1xf32>
    %cst_48 = arith.constant 9.99999974E-6 : f32
    %142 = vector.broadcast %cst_48 : f32 to vector<8x1xf32>
    %143 = arith.addf %141, %142 : vector<8x1xf32>
    %144 = math.rsqrt %143 : vector<8x1xf32>
    %145 = vector.broadcast %144 : vector<8x1xf32> to vector<8x32xf32>
    %146 = arith.mulf %136, %145 : vector<8x32xf32>
    %c8 = arith.constant 8 : index
    %c0_49 = arith.constant 0 : index
    %147 = vector.load %arg8[%c8, %c0_49] : memref<10x64xf32, #tpu.memory_space<vmem>>, vector<1x32xf32>
    %148 = vector.broadcast %147 : vector<1x32xf32> to vector<8x32xf32>
    %149 = arith.mulf %146, %148 : vector<8x32xf32>
    %c9 = arith.constant 9 : index
    %c0_50 = arith.constant 0 : index
    %150 = vector.load %arg8[%c9, %c0_50] : memref<10x64xf32, #tpu.memory_space<vmem>>, vector<1x32xf32>
    %151 = vector.broadcast %150 : vector<1x32xf32> to vector<8x32xf32>
    %152 = arith.addf %149, %151 : vector<8x32xf32>
    %153 = vector.shape_cast %152 : vector<8x32xf32> to vector<1x8x32xf32>
    %c0_51 = arith.constant 0 : index
    %c0_52 = arith.constant 0 : index
    %c0_53 = arith.constant 0 : index
    %154 = vector.load %arg9[%c0_51, %c0_52, %c0_53] : memref<1x8x32xf32, #tpu.memory_space<vmem>>, vector<1x8x32xf32>
    tpu.vector_store %arg9[%c0_51, %c0_52, %c0_53], %153 {strides = array<i32>} : memref<1x8x32xf32, #tpu.memory_space<vmem>>, vector<1x8x32xf32>,
    return
  }
  func.func @transform_0(%arg0: i32) -> (i32, i32, i32, i32) {
    %c0_i32 = arith.constant 0 : i32
    %c0_i32_0 = arith.constant 0 : i32
    %c0_i32_1 = arith.constant 0 : i32
    %c0_i32_2 = arith.constant 0 : i32
    return %arg0, %c0_i32, %c0_i32_0, %c0_i32_1 : i32, i32, i32, i32
  }
  func.func @transform_1(%arg0: i32) -> (i32, i32) {
    %c0_i32 = arith.constant 0 : i32
    %c0_i32_0 = arith.constant 0 : i32
    %c0_i32_1 = arith.constant 0 : i32
    return %c0_i32, %c0_i32_0 : i32, i32
  }
  func.func @transform_2(%arg0: i32) -> (i32, i32) {
    %c0_i32 = arith.constant 0 : i32
    %c0_i32_0 = arith.constant 0 : i32
    %c0_i32_1 = arith.constant 0 : i32
    return %c0_i32, %c0_i32_0 : i32, i32
  }
  func.func @transform_3(%arg0: i32) -> (i32, i32) {
    %c0_i32 = arith.constant 0 : i32
    %c0_i32_0 = arith.constant 0 : i32
    %c0_i32_1 = arith.constant 0 : i32
    return %c0_i32, %c0_i32_0 : i32, i32
  }
  func.func @transform_4(%arg0: i32) -> (i32, i32) {
    %c0_i32 = arith.constant 0 : i32
    %c0_i32_0 = arith.constant 0 : i32
    %c0_i32_1 = arith.constant 0 : i32
    return %c0_i32, %c0_i32_0 : i32, i32
  }
  func.func @transform_5(%arg0: i32) -> (i32, i32) {
    %c0_i32 = arith.constant 0 : i32
    %c0_i32_0 = arith.constant 0 : i32
    %c0_i32_1 = arith.constant 0 : i32
    return %c0_i32, %c0_i32_0 : i32, i32
  }
  func.func @transform_6(%arg0: i32) -> (i32, i32) {
    %c0_i32 = arith.constant 0 : i32
    %c0_i32_0 = arith.constant 0 : i32
    %c0_i32_1 = arith.constant 0 : i32
    return %c0_i32, %c0_i32_0 : i32, i32
  }
  func.func @transform_7(%arg0: i32) -> (i32, i32) {
    %c0_i32 = arith.constant 0 : i32
    %c0_i32_0 = arith.constant 0 : i32
    %c0_i32_1 = arith.constant 0 : i32
    return %c0_i32, %c0_i32_0 : i32, i32
  }
  func.func @transform_8(%arg0: i32) -> (i32, i32, i32) {
    %c0_i32 = arith.constant 0 : i32
    %c0_i32_0 = arith.constant 0 : i32
    %c0_i32_1 = arith.constant 0 : i32
    return %arg0, %c0_i32, %c0_i32_0 : i32, i32, i32
  }
  func.func @transform_9(%arg0: i32) -> (i32, i32, i32) {
    %c0_i32 = arith.constant 0 : i32
    %c0_i32_0 = arith.constant 0 : i32
    %c0_i32_1 = arith.constant 0 : i32
    return %arg0, %c0_i32, %c0_i32_0 : i32, i32, i32
  }
}

</mosaic_0001>

<bundles_post_ra>
// kernel: tpu_custom_call.1
= control target key start
LH: loop header
LB: loop body
LE: loop exit
PB: predicated region body
PF: predicated region fallthrough
CT: control target
= control target key end

     0   :  { %s1835_s0 = inlined_call_operand.vmem [shape: f32[2,2,8,32], index: 0, kind: input, shape index: {}]   ;;  %s1836_s1 = inlined_call_operand.vmem [shape: f32[32,32], index: 1, kind: input, shape index: {}]   ;;  %s1837_s2 = inlined_call_operand.vmem [shape: f32[32,32], index: 2, kind: input, shape index: {}]   ;;  %s1838_s3 = inlined_call_operand.hbm [shape: f32[32,32], index: 3, kind: input, shape index: {}]   ;;  %s1839_s4 = inlined_call_operand.hbm [shape: f32[32,32], index: 4, kind: input, shape index: {}]   ;;  %s1840_s5 = inlined_call_operand.hbm [shape: f32[32,64], index: 5, kind: input, shape index: {}]   ;;  %s1841_s6 = inlined_call_operand.vmem [shape: f32[64,32], index: 6, kind: input, shape index: {}]   ;;  %s1842_s7 = inlined_call_operand.hbm [shape: f32[10,64], index: 7, kind: input, shape index: {}]   ;;  %s1843_s8 = inlined_call_operand.hbm [shape: f32[2,8,32], index: 8, kind: output, shape index: {0}]   ;;  %s1844_s9 = inlined_call_operand.hbm [shape: f32[2,8,8], index: 9, kind: output, shape index: {1}]  }
   0x1   :  { %1848 = sst [smem:[#allocation21_spill]] %s1838_s3 }
   0x2   :  { %1849 = sst [smem:[#allocation22_spill]] %s1839_s4 }
   0x3   :  { %15 = vsyncpa [#allocation3], 0 }
   0x4   :  { %16 = vsyncpa [#allocation6], 0 }
   0x5   :  { %17 = vsyncpa [#allocation9], 0 }
   0x6   :  { %18 = vsyncpa [#allocation4], 0 }
   0x7   :  { %20 = vsyncpa [#allocation4 + $0x1], 0 }
   0x8   :  { %21 = vsyncpa [#allocation12], 0 }
   0x9   :  { %23 = vsyncpa [#allocation12 + $0x1], 0  ;;  %s1573_s30 = smov 0   ;;  %s1575_s10 = smov 0  }
   0xa   :  { %s1577_s11 = smov 0   ;;  %s1579_s12 = smov 0  }
   0xb LB: > { %1850 = sst [smem:[#allocation18_spill]] %s1504_s11  ;;  %s1594_s13 = sadd.s32 4294967295, %s1508_s12   ;;  %s1508_s12 = sphi %s1579_s12, %s1859_s12   ;;  %s1504_s11 = sphi %s1577_s11, %s1861_s11   ;;  %s1500_s10 = sphi %s1575_s10, %s1863_s10   ;;  %s1496_s30 = sphi %s1573_s30, %s1862_s30  }
   0xc   : > { %s1115_s14 = sadd.s32 4294967294, %s1508_s12   ;;  %s1598_s15 = sadd.s32 1, %s1508_s12  }
   0xd   : > { %1851 = sst [smem:[#allocation19_spill]] %s1598_s15  ;;  %s209_s16 = sadd.s32 1, %s1504_s11 }
   0xe   : > { %s206_s17 = ssub.s32 %s1508_s12, %s1598_s15  ;;  %p219_p0 = scmp.ne.s32.totalorder %s1504_s11, %s1500_s10 }
   0xf   : > { %p207_p1 = scmp.eq.s32.totalorder %s206_s17, 0  ;;  %p220_p2 = scmp.eq.s32.totalorder %s1594_s13, 1 }
  0x10   : > { %p225_p3 = scmp.ne.s32.totalorder %s1500_s10, %s1496_s30  ;;  %p226_p4 = scmp.eq.s32.totalorder %s1115_s14, 1 }
  0x11   : > { %s1609_s18 = scalar_select %p207_p1, %s1504_s11, %s209_s16  }
  0x12   : > { %p1611_p5 = por %p220_p2, %p219_p0  ;;  %p1615_p6 = por %p226_p4, %p225_p3 }
  0x13   : > { %1852 = sst [smem:[#allocation20_spill]] %s1609_s18  ;;  %p1116_p7 = scmp.ge.s32.totalorder %s1508_s12, 1 }
  0x14   : > { %p259_p8 = scmp.lt.s32.totalorder %s1508_s12, 3  ;;  %p1196_p9 = scmp.eq.s32.totalorder %s1594_s13, 0 }
  0x15   : > { %s1856_s4 = sld [smem:[#allocation22_spill]]  ;;  %s1510_s29 = smov [#allocation5]  }
  0x16   : > { %p1622_p10 = pnand %p1116_p7, %p259_p8  ;;  %s1857_s3 = sld [smem:[#allocation21_spill]] }
  0x17   : > { %s292_s14 = sshll.u32 %s1510_s29, 4  ;;  %s1511_s16 = smov 128   ;;  %s293_s14 = int_to_ptr.vmem [resolvable:$true] %s292_s14 }
  0x18   : > { %p1176_p11 = pneg %p1622_p10  ;;  %s1512_s17 = smov 8  }
  0x19   : > { %s1513_s22 = smov [#allocation2]   ;;  %s321_s18 = sshll.u32 %s1842_s7, 4  ;;  %s322_s18 = int_to_ptr.hbm [resolvable:$true] %s321_s18 }
  0x1a   : > { %p1636_p12 = pnand %p1196_p9, %p1176_p11  ;;  %s278_s23 = sshll.u32 %s1513_s22, 4  ;;  %s279_s23 = int_to_ptr.vmem [resolvable:$true] %s278_s23 }
  0x1b   : > { %s290_s24 = sshll.u32 %s1856_s4, 4  ;;  %s1514_s11 = smov [#allocation7]   ;;  %s291_s24 = int_to_ptr.hbm [resolvable:$true] %s290_s24 }
  0x1c   : > { %s276_s27 = sshll.u32 %s1857_s3, 4  ;;  %s304_s3 = sshll.u32 %s1840_s5, 4  ;;  %s277_s27 = int_to_ptr.hbm [resolvable:$true] %s276_s27  ;;  %s305_s3 = int_to_ptr.hbm [resolvable:$true] %s304_s3 }
  0x1d   : > { %1182 = dma.hbm_to_vmem [thread:$0]  (!%p1636_p12), %s291_s24, 512, %s293_s14, [#allocation6], %s1511_s16, %s1511_s16, %s1512_s17  }
  0x1e   : > { %1179 = dma.hbm_to_vmem [thread:$0]  (!%p1636_p12), %s277_s27, 512, %s279_s23, [#allocation3], %s1511_s16, %s1511_s16, %s1512_s17  }
  0x1f   : > { %s306_s15 = sshll.u32 %s1514_s11, 4  ;;  %s1515_s24 = smov [#allocation8]   ;;  %s307_s15 = int_to_ptr.vmem [resolvable:$true] %s306_s15 }
  0x20   : > { %1185 = dma.hbm_to_vmem [thread:$0]  (!%p1636_p12), %s305_s3, 512, %s307_s15, [#allocation6], %s1511_s16, %s1511_s16, %s1512_s17  }
  0x21   : > { %s323_s14 = sshll.u32 %s1515_s24, 4  ;;  %347 = sbr.rel (%p1622_p10) target bundleno = 1905 (0x771), region = 52  ;;  %s324_s14 = int_to_ptr.vmem [resolvable:$true] %s323_s14 }
  0x22   : > { %1188 = dma.hbm_to_vmem [thread:$0]  (!%p1636_p12), %s322_s18, 256, %s324_s14, [#allocation9], %s1511_s16, %s1511_s16, %s1512_s17  }
  0x26   : > { %1475 = dma.done.wait (%p1196_p9), [#allocation3], 512  }
  0x27   : > { %1477 = vsyncadd (%p1196_p9), [#allocation3], 4294966784 }
  0x28   : > { %1479 = dma.done.wait (%p1196_p9), [#allocation6], 1024  }
  0x29   : > { %1481 = vsyncadd (%p1196_p9), [#allocation6], 4294966272 }
  0x2a   : > { %1483 = dma.done.wait (%p1196_p9), [#allocation9], 256  }
  0x2b   : > { %1485 = vsyncadd (%p1196_p9), [#allocation9], 4294967040  ;;  %p404_p13 = scmp.lt.s32.totalorder %s1594_s13, 1  ;;  %v415_v0 = vld [vmem:[%s1836_s1 + $0x18] sm:$0xff]  ;;  %v414_v1 = vld [vmem:[%s1836_s1 + $0x10] sm:$0xff]  ;;  %vm418_vm0 = vcmask 261120  }
  0x2c   : > { %434 = vmatpush.msra.mxu1 %v415_v0  ;;  %v413_v4 = vld [vmem:[%s1836_s1 + $0x8] sm:$0xff]  ;;  %v412_v5 = vld [vmem:[%s1836_s1] sm:$0xff]  ;;  %v445_v7 = vld [vmem:[%s1837_s2 + $0x18] sm:$0xff]  ;;  %vm521_vm1 = vcmask 64512   ;;  %s1517_s21 = smov 120   ;;  %s1518_s27 = smov 104  }
  0x2d   : > { %s405_s3 = scalar_select %p404_p13, %s1594_s13, 1  ;;  %v444_v8 = vld [vmem:[%s1837_s2 + $0x10] sm:$0xff]  ;;  %v443_v9 = vld [vmem:[%s1837_s2 + $0x8] sm:$0xff]  ;;  %v442_v10 = vld [vmem:[%s1837_s2] sm:$0xff]  ;;  %vm784_vm2 = vcmask 130048   ;;  %vm786_vm3 = vcmask 195584  }
  0x2e   : > { %435 = vmatpush.msra.mxu1 %v414_v1  ;;  %v1250_v11 = vld [vmem:[#allocation8] ss:$0 sm:$0xff]  ;;  %v1251_v14 = vld [vmem:[#allocation8 + $0x1] ss:$0 sm:$0xff]  ;;  %v471_v23 = vld [vmem:[#allocation2 + $0x18] sm:$0xff]  ;;  %s1733_s28 = sand.u32 1, %s1500_s10  }
  0x2f   : > { %s1155_s4 = sshll.u32 %s405_s3, 4  ;;  %v470_v24 = vld [vmem:[#allocation2 + $0x10] sm:$0xff]  ;;  %489 = vmatpush.msra.mxu2 %v471_v23  ;;  %v469_v25 = vld [vmem:[#allocation2 + $0x8] sm:$0xff]  ;;  %v468_v26 = vld [vmem:[#allocation2] sm:$0xff]  ;;  %s1127_s16 = sshll.u32 %s1733_s28, 3  ;;  %vm893_vm8 = vcmask 523264  }
  0x30   : > { %s408_s18 = scalar_lea.vmem %s1835_s0, %s1155_s4  ;;  %436 = vmatpush.msra.mxu1 %v413_v4  ;;  %v1252_v36 = vld [vmem:[#allocation8 + $0x2] ss:$0 sm:$0xff]  ;;  %s1739_s17 = scalar_lea.vmem [#allocation11], %s1127_s16 }
  0x31   : > { %v1679_v2 = vld [vmem:[%s408_s18] sm:$0xff]  ;;  %v410_v3 = vld [vmem:[%s408_s18 + $0x8] sm:$0xff]  ;;  %s1516_s18 = smov 112   ;;  %490 = vmatpush.msra.mxu2 %v470_v24  ;;  %s1519_s22 = smov 16  }
  0x32   : > { %v411_v6 = vadd.f32 %v410_v3, %v1679_v2  ;;  %437 = vmatpush.msra.mxu1 %v412_v5  ;;  %s1520_s23 = smov 8   ;;  %s1521_s25 = smov 24  }
  0x33   : > { %491 = vmatpush.msra.mxu2 %v469_v25  ;;  %s1151_s24 = sshll.u32 %s1594_s13, 3  ;;  %s979_s11 = sshll.u32 %s1739_s17, 4  ;;  %s980_s11 = int_to_ptr.vmem [resolvable:$true] %s979_s11 }
  0x34   : > { %1131 = vmatmul.msk.f32.vlgmr.msra.gmra.mxu1 %vm418_vm0, %v411_v6  ;;  %s977_s4 = scalar_lea.hbm %s1844_s9, %s1151_s24 }
  0x35   : > { %460 = vmatpush.msrb.mxu1 %v445_v7  ;;  %492 = vmatpush.msra.mxu2 %v468_v26  ;;  %s981_s15 = sshll.u32 %s977_s4, 4  ;;  %s982_s15 = int_to_ptr.hbm [resolvable:$true] %s981_s15 }
  0x36   : > { %1133 = vmatmul.msk.f32.vlgmr.msra.gmra.mxu2 %vm418_vm0, %v1679_v2 }
  0x37   : > { %461 = vmatpush.msrb.mxu1 %v444_v8 }
  0x39   : > { %462 = vmatpush.msrb.mxu1 %v443_v9 }
  0x3b   : > { %463 = vmatpush.msrb.mxu1 %v442_v10 }
  0x3c   : > { %1132 = vmatmul.msk.f32.vlgmr.msrb.gmra.mxu1 %vm418_vm0, %v411_v6 }
  0xb1   : > { %v439_v12 = vpop.f32.mrf.mxu1 }
  0xb2   : > { %v440_v13 = vadd.f32 %v1250_v11, %v439_v12 }
  0xb4   : > { %500 = vrot.lane.b32.xlu2 %v440_v13, %s1516_s18 }
  0xb9   : > { %v465_v15 = vpop.f32.mrf.mxu1  ;;  %v494_v39 = vpop.f32.mrf.mxu2 }
  0xba   : > { %v466_v16 = vadd.f32 %v1251_v14, %v465_v15  ;;  %v495_v40 = vadd.f32 %v1252_v36, %v494_v39 }
  0xbc   : > { %507 = vrot.lane.b32.xlu1 %v466_v16, %s1516_s18  ;;  %505 = vrot.lane.b32.xlu0 %v466_v16, %s1517_s21 }
  0xbd   : > { %1134 = vmatpush.xpose.msk.msra.mxu3 %vm521_vm1, %v466_v16  ;;  %502 = vrot.lane.b32.xlu2 %v440_v13, %s1518_s27 }
  0xbe   : > { %697 = vmatpush.msrb.mxu2 %v495_v40 }
  0xc0   : > { %1135 = vmatmul.msk.f32.vlgmr.msra.gmra.mxu3 %vm521_vm1, %v440_v13 }
  0xc4   : > { %509 = vrot.lane.b32.xlu1 %v466_v16, %s1518_s27  ;;  %498 = vrot.lane.b32.xlu0 %v440_v13, %s1517_s21 }
 0x10e   : > { %v501_v19 = vpop.permute.xlu2 %500 }
 0x117   : > { %v503_v22 = vpop.permute.xlu2 %502 }
 0x12e   : > { %v508_v17 = vpop.permute.xlu1 %507  ;;  %v506_v18 = vpop.permute.xlu0 %505 }
 0x12f   : > { %1136 = vmatpush.xpose.msk.msrb.mxu3 %vm521_vm1, %v506_v18  ;;  %1138 = vmatpush.xpose.msk.msra.mxu0 %vm521_vm1, %v508_v17 }
 0x132   : > { %1139 = vmatmul.msk.f32.vlgmr.msra.gmra.mxu0 %vm521_vm1, %v501_v19 }
 0x136   : > { %v510_v20 = vpop.permute.xlu1 %509  ;;  %v499_v21 = vpop.permute.xlu0 %498 }
 0x137   : > { %1137 = vmatmul.msk.f32.vlgmr.msrb.gmra.mxu3 %vm521_vm1, %v499_v21  ;;  %1140 = vmatpush.xpose.msk.msra.mxu1 %vm521_vm1, %v510_v20 }
 0x13a   : > { %1141 = vmatmul.msk.f32.vlgmr.msra.gmra.mxu1 %vm521_vm1, %v503_v22 }
 0x143   : > { %v543_v29 = vpop.f32.mrf.mxu3 }
 0x144   : > { %v618_v34 = vsel %vm521_vm1, %v543_v29, -inf }
 0x1af   : > { %v591_v27 = vpop.f32.mrf.mxu0 }
 0x1b0   : > { %v624_v28 = vsel %vm521_vm1, %v591_v27, -inf }
 0x1b1   : > { %625 = vmax.xlane.f32.xlu1 %v624_v28 }
 0x1b7   : > { %v615_v30 = vpop.f32.mrf.mxu1 }
 0x1b8   : > { %v627_v31 = vsel %vm521_vm1, %v615_v30, -inf }
 0x1b9   : > { %628 = vmax.xlane.f32.xlu2 %v627_v31  ;;  %v789_v31 = vld [vmem:[#allocation5 + $0x8] sm:$0xff] }
 0x1ba   : > { %v567_v32 = vpop.f32.mrf.mxu3 }
 0x1bb   : > { %v621_v33 = vsel %vm521_vm1, %v567_v32, -inf }
 0x1bc   : > { %622 = vmax.xlane.f32.xlu0 %v621_v33 }
 0x1c1   : > { %619 = vmax.xlane.f32.xlu2 %v618_v34 }
 0x224   : > { %v626_v35 = vpop.xlane.xlu1 %625 }
 0x225   : > { %v632_v37 = vsub.f32 %v591_v27, %v626_v35 }
 0x227   : > { %v638_v38 = vmul.f32 1.442695, %v632_v37 }
 0x229   : > { %1260 = vpow2.f32 %v638_v38 }
 0x22c   : > { %v629_v41 = vpop.xlane.xlu2 %628 }
 0x22d   : > { %v633_v42 = vsub.f32 %v615_v30, %v629_v41  ;;  %v790_v30 = vld [vmem:[#allocation5 + $0x10] sm:$0xff] }
 0x22f   : > { %v1261_v43 = vpop.eup %1260  ;;  %v640_v44 = vmul.f32 1.442695, %v633_v42  ;;  %v623_v45 = vpop.xlane.xlu0 %622 }
 0x230   : > { %v631_v46 = vsub.f32 %v567_v32, %v623_v45  ;;  %v648_v47 = vsel %vm521_vm1, %v1261_v43, 0.0  ;;  %v788_v32 = vld [vmem:[#allocation5] sm:$0xff]  ;;  %v1522_v45 = vmov 32.0  }
 0x231   : > { %1262 = vpow2.f32 %v640_v44  ;;  %649 = vadd.xlane.f32.xlu1 %v648_v47 }
 0x232   : > { %v636_v48 = vmul.f32 1.442695, %v631_v46 }
 0x234   : > { %1264 = vpow2.f32 %v636_v48  ;;  %v620_v53 = vpop.xlane.xlu2 %619 }
 0x235   : > { %v630_v54 = vsub.f32 %v543_v29, %v620_v53  ;;  %v791_v29 = vld [vmem:[#allocation5 + $0x18] sm:$0xff] }
 0x236   : > { %809 = vmatpush.msra.mxu2 %v791_v29 }
 0x237   : > { %v1263_v49 = vpop.eup %1262  ;;  %v634_v55 = vmul.f32 1.442695, %v630_v54 }
 0x238   : > { %v651_v50 = vsel %vm521_vm1, %v1263_v49, 0.0  ;;  %810 = vmatpush.msra.mxu2 %v790_v30 }
 0x239   : > { %652 = vadd.xlane.f32.xlu2 %v651_v50  ;;  %1266 = vpow2.f32 %v634_v55 }
 0x23a   : > { %v1265_v51 = vpop.eup %1264  ;;  %811 = vmatpush.msra.mxu2 %v789_v31 }
 0x23b   : > { %v645_v52 = vsel %vm521_vm1, %v1265_v51, 0.0 }
 0x23c   : > { %646 = vadd.xlane.f32.xlu0 %v645_v52  ;;  %812 = vmatpush.msra.mxu2 %v788_v32 }
 0x23f   : > { %v1267_v56 = vpop.eup %1266 }
 0x240   : > { %v642_v57 = vsel %vm521_vm1, %v1267_v56, 0.0 }
 0x24a   : > { %515 = vrot.lane.b32.xlu1 %v495_v40, %s1516_s18  ;;  %s953_s18 = scalar_lea.sflag [#allocation12], %s1733_s28 }
 0x250   : > { %512 = vrot.lane.b32.xlu0 %v495_v40, %s1517_s21  ;;  %s1416_s21 = sshra.s32 %s982_s15, 4  ;;  %s1417_s21 = int_to_ptr.hbm [resolvable:$true] %s1416_s21 }
 0x251   : > { %518 = vrot.lane.b32.xlu2 %v495_v40, %s1518_s27  ;;  %v1253_v40 = vld [vmem:[#allocation8 + $0x3] ss:$0 sm:$0xff]  ;;  %s1418_s27 = scalar_lea.hbm %s1417_s21, 8  ;;  %p1423_p3 = scmp.lt.s32.totalorder %s1417_s21, %s1844_s9 }
 0x252   : > { %p1419_p0 = scmp.ne.s32.totalorder %s1417_s21, %s1418_s27 }
 0x254   : > { %p1420_p1 = pnand %p1419_p0, %p1611_p5 }
 0x256   : > { %p1421_p2 = pneg %p1420_p1 }
 0x27a   : > { %643 = vadd.xlane.f32.xlu0 %v642_v57  ;;  %v855_v57 = vld [vmem:[#allocation7 + $0x10] sm:$0xff] }
 0x2a4   : > { %v650_v58 = vpop.xlane.xlu1 %649 }
 0x2a5   : > { %1268 = vrcp.f32 %v650_v58 }
 0x2ab   : > { %v1269_v60 = vpop.eup %1268 }
 0x2ac   : > { %v653_v59 = vpop.xlane.xlu2 %652  ;;  %v660_v62 = vmul.f32 %v1269_v60, %v650_v58  ;;  %v854_v58 = vld [vmem:[#allocation7 + $0x8] sm:$0xff] }
 0x2ad   : > { %1270 = vrcp.f32 %v653_v59 }
 0x2ae   : > { %v664_v0 = vsub.f32 2.0, %v660_v62  ;;  %v888_v62 = vld [vmem:[%s1841_s6 + $0x28] sm:$0xff] }
 0x2af   : > { %v647_v61 = vpop.xlane.xlu0 %646 }
 0x2b0   : > { %1272 = vrcp.f32 %v647_v61  ;;  %v668_v7 = vmul.f32 %v1269_v60, %v664_v0  ;;  %v890_v60 = vld [vmem:[%s1841_s6 + $0x38] sm:$0xff] }
 0x2b2   : > { %v672_v11 = vmul.f32 %v1261_v43, %v668_v7 }
 0x2b3   : > { %v1271_v63 = vpop.eup %1270 }
 0x2b4   : > { %v661_v1 = vmul.f32 %v1271_v63, %v653_v59  ;;  %v519_v3 = vpop.permute.xlu2 %518  ;;  %v853_v59 = vld [vmem:[#allocation7] sm:$0xff] }
 0x2b5   : > { %766 = vmatpush.msrb.mxu1 %v519_v3 }
 0x2b6   : > { %v1273_v4 = vpop.eup %1272  ;;  %v665_v5 = vsub.f32 2.0, %v661_v1  ;;  %v887_v1 = vld [vmem:[%s1841_s6 + $0x20] sm:$0xff] }
 0x2b7   : > { %v659_v6 = vmul.f32 %v1273_v4, %v647_v61  ;;  %v889_v61 = vld [vmem:[%s1841_s6 + $0x30] sm:$0xff] }
 0x2b8   : > { %v669_v8 = vmul.f32 %v1271_v63, %v665_v5 }
 0x2b9   : > { %v663_v10 = vsub.f32 2.0, %v659_v6 }
 0x2ba   : > { %v673_v9 = vmul.f32 %v1263_v49, %v669_v8 }
 0x2bb   : > { %v667_v13 = vmul.f32 %v1273_v4, %v663_v10  ;;  %v886_v4 = vld [vmem:[%s1841_s6 + $0x18] sm:$0xff] }
 0x2bc   : > { %v516_v12 = vpop.permute.xlu1 %515  ;;  %1145 = vmatmul.msk.f32.vlgmr.msrb.gmra.mxu1 %vm521_vm1, %v673_v9 }
 0x2bd   : > { %743 = vmatpush.msrb.mxu0 %v516_v12  ;;  %v671_v14 = vmul.f32 %v1265_v51, %v667_v13 }
 0x2be   : > { %1144 = vmatmul.msk.f32.vlgmr.msrb.gmra.mxu0 %vm521_vm1, %v672_v11 }
 0x2bf   : > { %905 = vmatpush.msra.mxu0 %v890_v60 }
 0x2c1   : > { %906 = vmatpush.msra.mxu0 %v889_v61 }
 0x2c2   : > { %v513_v15 = vpop.permute.xlu0 %512 }
 0x2c3   : > { %720 = vmatpush.msra.mxu3 %v513_v15  ;;  %907 = vmatpush.msra.mxu0 %v888_v62 }
 0x2c4   : > { %1143 = vmatmul.msk.f32.vlgmr.msra.gmra.mxu3 %vm521_vm1, %v671_v14 }
 0x2c5   : > { %908 = vmatpush.msra.mxu0 %v887_v1 }
 0x2c7   : > { %909 = vmatpush.msra.mxu0 %v886_v4 }
 0x2ed   : > { %v644_v16 = vpop.xlane.xlu0 %643 }
 0x2ee   : > { %1274 = vrcp.f32 %v644_v16 }
 0x2ef   : > { %1276 = vrcp.f32 %v1522_v45 }
 0x2f4   : > { %v1275_v17 = vpop.eup %1274 }
 0x2f5   : > { %v658_v18 = vmul.f32 %v1275_v17, %v644_v16  ;;  %v1277_v46 = vpop.eup %1276 }
 0x2f6   : > { %v822_v47 = vmul.f32 32.0, %v1277_v46  ;;  %vm826_vm4 = vweird.f32 %v1277_v46 }
 0x2f7   : > { %v662_v19 = vsub.f32 2.0, %v658_v18  ;;  %v884_v18 = vld [vmem:[%s1841_s6 + $0x8] sm:$0xff] }
 0x2f8   : > { %v823_v48 = vsub.f32 1.0, %v822_v47 }
 0x2f9   : > { %v666_v20 = vmul.f32 %v1275_v17, %v662_v19  ;;  %v885_v17 = vld [vmem:[%s1841_s6 + $0x10] sm:$0xff]  ;;  %v883_v19 = vld [vmem:[%s1841_s6] sm:$0xff] }
 0x2fa   : > { %v824_v49 = vmul.f32 %v1277_v46, %v823_v48  ;;  %910 = vmatpush.msra.mxu0 %v885_v17 }
 0x2fb   : > { %v670_v21 = vmul.f32 %v1267_v56, %v666_v20  ;;  %v856_v56 = vld [vmem:[#allocation7 + $0x18] sm:$0xff]  ;;  %v1256_v20 = vld [vmem:[#allocation8 + $0x6] ss:$0 sm:$0xff] }
 0x2fc   : > { %v825_v50 = vadd.f32 %v1277_v46, %v824_v49  ;;  %874 = vmatpush.msrb.mxu3 %v856_v56  ;;  %911 = vmatpush.msra.mxu0 %v884_v18 }
 0x2fd   : > { %v674_v22 = vadd.f32 %v671_v14, %v670_v21  ;;  %1142 = vmatmul.msk.f32.vlgmr.msrb.gmra.mxu2 %vm521_vm1, %v670_v21  ;;  %v1255_v14 = vld [vmem:[#allocation8 + $0x5] ss:$0 sm:$0xff] }
 0x2fe   : > { %v1747_v51 = vsel %vm826_vm4, %v1277_v46, %v825_v50  ;;  %875 = vmatpush.msrb.mxu3 %v855_v57  ;;  %912 = vmatpush.msra.mxu0 %v883_v19 }
 0x2ff   : > { %v675_v23 = vadd.f32 %v674_v22, %v672_v11  ;;  %v1254_v11 = vld [vmem:[#allocation8 + $0x4] ss:$0 sm:$0xff] }
 0x300   : > { %876 = vmatpush.msrb.mxu3 %v854_v58 }
 0x301   : > { %v676_v24 = vadd.f32 %v675_v23, %v673_v9 }
 0x302   : > { %877 = vmatpush.msrb.mxu3 %v853_v59 }
 0x303   : > { %v677_v25 = vmul.f32 0.25, %v676_v24  ;;  %v1257_v24 = vld [vmem:[#allocation8 + $0x7] ss:$0 sm:$0xff] }
 0x305   : > { %678 = vst.msk [vmem:[%s1739_s17] sm:$0xff] %vm521_vm1, %v677_v25 }
 0x339   : > { %v768_v28 = vpop.f32.mrf.mxu1 }
 0x33b   : > { %v745_v26 = vpop.f32.mrf.mxu0 }
 0x33c   : > { %776 = vrot.lane.b32.xlu2 %v745_v26, %s1519_s22 }
 0x347   : > { %v722_v27 = vpop.f32.mrf.mxu3 }
 0x348   : > { %772 = vrot.lane.b32.xlu1 %v722_v27, %s1520_s23 }
 0x350   : > { %780 = vrot.lane.b32.xlu1 %v768_v28, %s1521_s25  ;;  %s1422_s25 = scalar_lea.hbm %s1844_s9, 16 }
 0x351   : > { %p1424_p4 = scmp.lt.s32.totalorder %s1422_s25, %s1418_s27 }
 0x353   : > { %p1425_p7 = por %p1424_p4, %p1423_p3 }
 0x355   : > { %p1426_p8 = pnand %p1425_p7, %p1421_p2 }
 0x380   : > { %v699_v34 = vpop.f32.mrf.mxu2 }
 0x396   : > { %v777_v36 = vpop.permute.xlu2 %776 }
 0x3ba   : > { %v773_v33 = vpop.permute.xlu1 %772 }
 0x3bb   : > { %v783_v35 = vsel %vm521_vm1, %v699_v34, %v773_v33 }
 0x3bc   : > { %v785_v38 = vsel %vm784_vm2, %v783_v35, %v777_v36 }
 0x3c2   : > { %v781_v37 = vpop.permute.xlu1 %780 }
 0x3c3   : > { %v787_v39 = vsel %vm786_vm3, %v785_v38, %v781_v37 }
 0x3c4   : > { %1146 = vmatmul.msk.f32.vlgmr.msra.gmra.mxu2 %vm418_vm0, %v787_v39 }
 0x447   : > { %v814_v41 = vpop.f32.mrf.mxu2 }
 0x448   : > { %v815_v42 = vadd.f32 %v1253_v40, %v814_v41 }
 0x44a   : > { %v817_v43 = vadd.f32 %v815_v42, %v1679_v2 }
 0x44c   : > { %v818_v44 = vsel %vm418_vm0, %v817_v43, 0.0 }
 0x44d   : > { %819 = vadd.xlane.f32.xlu2 %v818_v44 }
 0x4c0   : > { %v820_v52 = vpop.xlane.xlu2 %819 }
 0x4c1   : > { %v828_v53 = vmul.f32 %v1747_v51, %v820_v52 }
 0x4c3   : > { %v829_v54 = vsub.f32 %v817_v43, %v828_v53 }
 0x4c5   : > { %v830_v55 = vmul.f32 %v829_v54, %v829_v54 }
 0x4c7   : > { %v831_v2 = vsel %vm418_vm0, %v830_v55, 0.0 }
 0x4c8   : > { %832 = vadd.xlane.f32.xlu1 %v831_v2 }
 0x53b   : > { %v833_v63 = vpop.xlane.xlu1 %832 }
 0x53c   : > { %v834_v0 = vmul.f32 %v833_v63, %v1747_v51 }
 0x53e   : > { %v835_v3 = vadd.f32 1e-05, %v834_v0 }
 0x540   : > { %1278 = vrsqrt.f32 %v835_v3  ;;  %vm842_vm6 = vweird.f32 %v835_v3 }
 0x546   : > { %v1279_v5 = vpop.eup %1278 }
 0x547   : > { %v837_v6 = vmul.f32 %v1279_v5, %v835_v3  ;;  %vm843_vm5 = vweird.f32 %v1279_v5 }
 0x548   : > { %vm844_vm7 = vmor %vm842_vm6, %vm843_vm5 }
 0x549   : > { %v838_v7 = vmul.f32 %v1279_v5, %v837_v6 }
 0x54b   : > { %v839_v8 = vmul.f32 0.5, %v838_v7 }
 0x54d   : > { %v840_v9 = vsub.f32 1.5, %v839_v8 }
 0x54f   : > { %v841_v10 = vmul.f32 %v1279_v5, %v840_v9 }
 0x551   : > { %v845_v12 = vsel %vm844_vm7, %v1279_v5, %v841_v10 }
 0x552   : > { %v846_v13 = vmul.f32 %v845_v12, %v829_v54 }
 0x554   : > { %v849_v15 = vmul.f32 %v1254_v11, %v846_v13 }
 0x556   : > { %v852_v16 = vadd.f32 %v1255_v14, %v849_v15 }
 0x558   : > { %1147 = vmatmul.msk.f32.vlgmr.msrb.gmra.mxu3 %vm418_vm0, %v852_v16 }
 0x5db   : > { %v879_v21 = vpop.f32.mrf.mxu3 }
 0x5dc   : > { %v880_v22 = vadd.f32 %v1256_v20, %v879_v21 }
 0x5de   : > { %v882_v23 = vmax.f32 %v880_v22, 0.0 }
 0x5e0   : > { %1148 = vmatmul.msk.f32.vlgmr.msra.gmra.mxu0 %vm893_vm8, %v882_v23 }
 0x65d   : > { %v914_v25 = vpop.f32.mrf.mxu0 }
 0x65e   : > { %v915_v26 = vadd.f32 %v1257_v24, %v914_v25 }
 0x660   : > { %v917_v27 = vadd.f32 %v915_v26, %v852_v16 }
 0x662   : > { %v918_v28 = vsel %vm418_vm0, %v917_v27, 0.0 }
 0x663   : > { %919 = vadd.xlane.f32.xlu0 %v918_v28 }
 0x6d6   : > { %v920_v29 = vpop.xlane.xlu0 %919 }
 0x6d7   : > { %v921_v30 = vmul.f32 %v920_v29, %v1747_v51 }
 0x6d9   : > { %v922_v31 = vsub.f32 %v917_v27, %v921_v30 }
 0x6db   : > { %v923_v32 = vmul.f32 %v922_v31, %v922_v31 }
 0x6dd   : > { %v924_v33 = vsel %vm418_vm0, %v923_v32, 0.0 }
 0x6de   : > { %925 = vadd.xlane.f32.xlu0 %v924_v33 }
 0x6df   : > { %1429 = shalt.err (!%p1426_p8)
}
 0x6e0   : > { %1173 = dma.vmem_to_hbm [thread:$0]  (%p1611_p5), %s980_s11, 128, %s982_s15, %s953_s18   ;;  %v1258_v43 = vld [vmem:[#allocation8 + $0x8] ss:$0 sm:$0xff]  ;;  %v1259_v46 = vld [vmem:[#allocation8 + $0x9] ss:$0 sm:$0xff] }
 0x6e1   : > { %s963_s3 = scalar_lea.hbm %s1843_s8, %s1151_s24  ;;  %s396_s4 = scalar_lea.vmem [#allocation10], %s1127_s16 }
 0x6e2   : > { %s965_s11 = sshll.u32 %s396_s4, 4  ;;  %s967_s15 = sshll.u32 %s963_s3, 4  ;;  %s966_s11 = int_to_ptr.vmem [resolvable:$true] %s965_s11  ;;  %s968_s15 = int_to_ptr.hbm [resolvable:$true] %s967_s15 }
 0x6e3   : > { %s948_s18 = scalar_lea.sflag [#allocation4], %s1733_s28  ;;  %s1444_s13 = sshra.s32 %s968_s15, 4  ;;  %s1445_s13 = int_to_ptr.hbm [resolvable:$true] %s1444_s13 }
 0x6e4   : > { %s1446_s21 = scalar_lea.hbm %s1445_s13, 8  ;;  %s1450_s16 = scalar_lea.hbm %s1843_s8, 16 }
 0x6e5   : > { %p1447_p9 = scmp.ne.s32.totalorder %s1445_s13, %s1446_s21  ;;  %p1451_p12 = scmp.lt.s32.totalorder %s1445_s13, %s1843_s8 }
 0x6e6   : > { %p1452_p13 = scmp.lt.s32.totalorder %s1450_s16, %s1446_s21 }
 0x6e7   : > { %p1448_p10 = pnand %p1447_p9, %p1611_p5 }
 0x6e8   : > { %p1453_p0 = por %p1452_p13, %p1451_p12 }
 0x6e9   : > { %p1449_p11 = pneg %p1448_p10 }
 0x6eb   : > { %p1454_p1 = pnand %p1453_p0, %p1449_p11 }
 0x751   : > { %v926_v34 = vpop.xlane.xlu0 %925 }
 0x752   : > { %v927_v35 = vmul.f32 %v926_v34, %v1747_v51 }
 0x754   : > { %v928_v36 = vadd.f32 1e-05, %v927_v35 }
 0x756   : > { %1280 = vrsqrt.f32 %v928_v36  ;;  %vm935_vm10 = vweird.f32 %v928_v36 }
 0x75c   : > { %v1281_v37 = vpop.eup %1280 }
 0x75d   : > { %v930_v38 = vmul.f32 %v1281_v37, %v928_v36  ;;  %vm936_vm9 = vweird.f32 %v1281_v37 }
 0x75e   : > { %vm937_vm11 = vmor %vm935_vm10, %vm936_vm9 }
 0x75f   : > { %v931_v39 = vmul.f32 %v1281_v37, %v930_v38 }
 0x761   : > { %v932_v40 = vmul.f32 0.5, %v931_v39 }
 0x763   : > { %v933_v41 = vsub.f32 1.5, %v932_v40 }
 0x765   : > { %v934_v42 = vmul.f32 %v1281_v37, %v933_v41 }
 0x767   : > { %v938_v44 = vsel %vm937_vm11, %v1281_v37, %v934_v42 }
 0x768   : > { %v939_v45 = vmul.f32 %v938_v44, %v922_v31 }
 0x76a   : > { %v942_v47 = vmul.f32 %v1258_v43, %v939_v45 }
 0x76c   : > { %v945_v48 = vadd.f32 %v1259_v46, %v942_v47 }
 0x76e   : > { %946 = vst.msk [vmem:[%s396_s4] sm:$0xff] %vm418_vm0, %v945_v48 }
 0x76f   : > { %1457 = shalt.err (!%p1454_p1)
}
 0x770   : > { %1172 = dma.vmem_to_hbm [thread:$0]  (%p1611_p5), %s966_s11, 128, %s968_s15, %s948_s18  }
 0x771 PF: > { %p1204_p2 = scmp.ge.s32.totalorder %s1508_s12, 2  ;;  %s993_s28 = sand.u32 1, %s1496_s30  }
 0x772   : > { %s994_s25 = scalar_lea.sflag [#allocation4], %s993_s28 }
 0x773   : > { %p1190_p3 = pnand %p1204_p2, %p1615_p6 }
 0x775   : > { %p1191_p4 = pneg %p1190_p3 }
 0x777   : > { %1487 = dma.done.wait (%p1191_p4), %s994_s25, 128  }
 0x778   : > { %1489 = vsyncadd (%p1191_p4), %s994_s25, 4294967168  ;;  %s1004_s26 = scalar_lea.sflag [#allocation12], %s993_s28 }
 0x779   : > { %1491 = dma.done.wait (%p1191_p4), %s1004_s26, 128  }
 0x77a   : > { %1493 = vsyncadd (%p1191_p4), %s1004_s26, 4294967168  ;;  %s1859_s12 = sld [smem:[#allocation19_spill]]  ;;  %s1862_s30 = smov %s1500_s10 }
 0x77b   : > { %s1860_s29 = sld [smem:[#allocation18_spill]] }
 0x77c   : > { %s1861_s11 = sld [smem:[#allocation20_spill]] }
 0x780   : > { %p26_p5 = scmp.ge.s32.totalorder %s1859_s12, 4  }
 0x781   : > { %s1863_s10 = smov %s1860_s29 }
 0x782   :  { %28 = sbr.rel (!%p26_p5) target bundleno = 11 (0xb), region = 121 }
 0x787   :  { %1010 = vsyncpa [#allocation3], 1 }
 0x788   :  { %1012 = vsyncpa [#allocation3 + $0x1], 1 }
 0x789   :  { %1013 = vsyncpa [#allocation6], 1 }
 0x78a   :  { %1014 = vsyncpa [#allocation9], 1 }
 0x78b   :  { %1015 = vsyncpa [#allocation4], 1 }
 0x78c   :  { %1017 = vsyncpa [#allocation4 + $0x1], 1 }
 0x78d   :  { %1018 = vsyncpa [#allocation12], 1 }
 0x78e   :  { %1020 = vsyncpa [#allocation12 + $0x1], 1 }

</bundles_post_ra>
